<compile_context>
chip_gen: v5e
topology: v5e:2x2
jax: 0.10.0
libtpu: 0.0.40
codegen_flags: <defaults>
</compile_context>

<pallas_src>
import functools
import math

import jax
import jax.numpy as jnp
from jax.experimental import pallas as pl
from jax.experimental.pallas import tpu as pltpu

_LOG_2PI = math.log(2.0 * math.pi)


def actor_kernel(sn_ref, w1_ref, b1_ref, w2_ref, b2_ref, wh_ref, bh_ref,
                 out_ref, *, state_dim, action_dim, max_action):
    sn = sn_ref[...]
    state = sn[:, :state_dim]
    eps = sn[:, state_dim:state_dim + action_dim]

    # fc1 + relu (bf16 into the MXU, f32 accumulate / elementwise)
    h1 = jnp.dot(state.astype(jnp.bfloat16), w1_ref[...],
                 preferred_element_type=jnp.float32) + b1_ref[...]
    h1 = jnp.maximum(h1, 0.0)

    # fc2 + relu
    h2 = jnp.dot(h1.astype(jnp.bfloat16), w2_ref[...],
                 preferred_element_type=jnp.float32) + b2_ref[...]
    h2 = jnp.maximum(h2, 0.0)

    # fused heads: one matmul produces [mean | log_std]
    heads = jnp.dot(h2.astype(jnp.bfloat16), wh_ref[...],
                    preferred_element_type=jnp.float32) + bh_ref[...]
    mean = heads[:, :action_dim]
    log_std = jnp.clip(heads[:, action_dim:2 * action_dim], -20.0, 2.0)
    std = jnp.exp(log_std)

    # reparameterized sample: action = mean + std * eps, then tanh squash
    action = mean + std * eps
    action_tanh = jnp.tanh(action)

    # Normal(mean, std).log_prob(action) = -0.5*eps^2 - log_std - 0.5*log(2*pi)
    log_prob = -0.5 * eps * eps - log_std - 0.5 * _LOG_2PI
    # tanh-squash correction; kept in the exact PyTorch form for semantic
    # parity (stable alternative: 2*(log2 - a - softplus(-2a))).
    log_prob = log_prob - jnp.log(1.0 - action_tanh * action_tanh + 1e-6)
    logp = jnp.sum(log_prob, axis=1, keepdims=True)

    # single lane-contiguous output slab: [max_action*tanh(a) | log_prob]
    fused = jnp.concatenate([max_action * action_tanh, logp], axis=1)
    out_ref[...] = fused.astype(out_ref.dtype)


def pack_params(params):
    """One-time packing: bf16 weights for the MXU, fused mean|log_std head."""
    return {
        "w1": params["w1"].astype(jnp.bfloat16),
        "b1": params["b1"],
        "w2": params["w2"].astype(jnp.bfloat16),
        "b2": params["b2"],
        "wh": jnp.concatenate([params["wm"], params["ws"]], axis=1).astype(jnp.bfloat16),
        "bh": jnp.concatenate([params["bm"], params["bs"]], axis=1),
    }


def _round_up(x, m):
    return ((x + m - 1) // m) * m


def actor_forward(state, packed, noise, max_action, *, block_b=2048):
    B, state_dim = state.shape
    hidden = packed["w1"].shape[1]
    two_a = packed["wh"].shape[1]
    action_dim = two_a // 2
    assert noise.shape == (B, action_dim)

    # Single pipelined input stream: [state | noise] along the lanes.
    sn = jnp.concatenate([state, noise], axis=1)
    in_dim = state_dim + action_dim
    out_dim = action_dim + 1

    # Batch tile: large enough to amortize the ~0.35us per-grid-step pipeline
    # overhead, capped so the grid keeps >= 2 parallel steps (v7x: 2 TCs),
    # always a multiple of 8 (f32 sublane). Fixed tile + cdiv grid keeps VMEM
    # bounded for any B; Pallas masks the partial last block.
    tb = max(8, min(block_b, _round_up(pl.cdiv(B, 2), 8)))
    grid = (pl.cdiv(B, tb),)

    def resident(shape):
        # Weights/biases: same block every grid step -> stay VMEM-resident.
        return pl.BlockSpec(shape, lambda i: (0, 0))

    kernel = functools.partial(actor_kernel, state_dim=state_dim,
                               action_dim=action_dim,
                               max_action=float(max_action))

    flops = 2 * B * (state_dim * hidden + hidden * hidden + hidden * two_a)
    w_bytes = sum(int(v.size) * v.dtype.itemsize
                  for v in (packed["w1"], packed["b1"], packed["w2"],
                            packed["b2"], packed["wh"], packed["bh"]))
    bytes_accessed = int(sn.size) * 4 + B * out_dim * 4 + w_bytes
    cost = pl.CostEstimate(flops=flops,
                           transcendentals=3 * B * action_dim,
                           bytes_accessed=bytes_accessed)

    fused = pl.pallas_call(
        kernel,
        out_shape=jax.ShapeDtypeStruct((B, out_dim), jnp.float32),
        grid=grid,
        in_specs=[
            pl.BlockSpec((tb, in_dim), lambda i: (i, 0)),      # state|noise (pipelined)
            resident((state_dim, hidden)),                     # w1
            resident((1, hidden)),                             # b1
            resident((hidden, hidden)),                        # w2
            resident((1, hidden)),                             # b2
            resident((hidden, two_a)),                         # fused head weights
            resident((1, two_a)),                              # fused head biases
        ],
        out_specs=pl.BlockSpec((tb, out_dim), lambda i: (i, 0)),
        compiler_params=pltpu.CompilerParams(
            dimension_semantics=("parallel",),                 # v7x: 2 TCs
            vmem_limit_bytes=32 * 1024 * 1024),                # v5e headroom
        cost_estimate=cost,
    )(sn, packed["w1"], packed["b1"], packed["w2"], packed["b2"],
      packed["wh"], packed["bh"])

    action = fused[:, :action_dim]
    log_prob = fused[:, action_dim:action_dim + 1]
    return action, log_prob


def init_params(key, state_dim, action_dim, hidden=256):
    """Deterministic synthetic init (PyTorch-Linear-like uniform fan-in)."""
    def linear(k, fan_in, fan_out):
        k_w, k_b = jax.random.split(k)
        bound = 1.0 / math.sqrt(fan_in)
        w = jax.random.uniform(k_w, (fan_in, fan_out), jnp.float32, -bound, bound)
        b = jax.random.uniform(k_b, (1, fan_out), jnp.float32, -bound, bound)
        return w, b

    k1, k2, k3, k4 = jax.random.split(key, 4)
    w1, b1 = linear(k1, state_dim, hidden)
    w2, b2 = linear(k2, hidden, hidden)
    wm, bm = linear(k3, hidden, action_dim)
    ws, bs = linear(k4, hidden, action_dim)
    return {"w1": w1, "b1": b1, "w2": w2, "b2": b2,
            "wm": wm, "bm": bm, "ws": ws, "bs": bs}


def actor_forward_ref(state, params, noise, max_action):
    """Pure-JAX reference with the same bf16-in / f32-accumulate matmuls."""
    def mm(x, w):
        return jnp.dot(x.astype(jnp.bfloat16), w.astype(jnp.bfloat16),
                       preferred_element_type=jnp.float32)
    h1 = jax.nn.relu(mm(state, params["w1"]) + params["b1"])
    h2 = jax.nn.relu(mm(h1, params["w2"]) + params["b2"])
    mean = mm(h2, params["wm"]) + params["bm"]
    log_std = jnp.clip(mm(h2, params["ws"]) + params["bs"], -20.0, 2.0)
    std = jnp.exp(log_std)
    action = mean + std * noise
    at = jnp.tanh(action)
    lp = -0.5 * noise * noise - log_std - 0.5 * _LOG_2PI
    lp = lp - jnp.log(1.0 - at * at + 1e-6)
    return max_action * at, jnp.sum(lp, axis=1, keepdims=True)


if __name__ == "__main__":
    state_dim = 16
    action_dim = 4
    max_action = 2.0

    key = jax.random.PRNGKey(0)
    k_params, k_state, k_noise = jax.random.split(key, 3)

    params = init_params(k_params, state_dim, action_dim)
    packed = pack_params(params)

    # Small batch (single grid step).
    batch = 8
    state = jax.random.normal(k_state, (batch, state_dim), jnp.float32)
    noise = jax.random.normal(k_noise, (batch, action_dim), jnp.float32)

    action, log_prob = actor_forward(state, packed, noise, max_action)
    jax.block_until_ready((action, log_prob))

    a_ref, lp_ref = actor_forward_ref(state, params, noise, max_action)
    assert jnp.allclose(action, a_ref, atol=1e-3, rtol=1e-3)
    assert jnp.allclose(log_prob, lp_ref, atol=1e-3, rtol=1e-3)

    # Larger, divisible batch -> 2 parallel grid steps.
    batch2 = 512
    state2 = jax.random.normal(jax.random.PRNGKey(1), (batch2, state_dim), jnp.float32)
    noise2 = jax.random.normal(jax.random.PRNGKey(2), (batch2, action_dim), jnp.float32)
    action2, log_prob2 = actor_forward(state2, packed, noise2, max_action)
    jax.block_until_ready((action2, log_prob2))

    a_ref2, lp_ref2 = actor_forward_ref(state2, params, noise2, max_action)
    assert jnp.allclose(action2, a_ref2, atol=1e-3, rtol=1e-3)
    assert jnp.allclose(log_prob2, lp_ref2, atol=1e-3, rtol=1e-3)

    # Non-divisible batch -> cdiv grid with a masked partial last block.
    batch3 = 300
    state3 = jax.random.normal(jax.random.PRNGKey(3), (batch3, state_dim), jnp.float32)
    noise3 = jax.random.normal(jax.random.PRNGKey(4), (batch3, action_dim), jnp.float32)
    action3, log_prob3 = actor_forward(state3, packed, noise3, max_action)
    jax.block_until_ready((action3, log_prob3))

    a_ref3, lp_ref3 = actor_forward_ref(state3, params, noise3, max_action)
    assert jnp.allclose(action3, a_ref3, atol=1e-3, rtol=1e-3)
    assert jnp.allclose(log_prob3, lp_ref3, atol=1e-3, rtol=1e-3)

    # TODO(synk): the `deterministic=True` branch (max_action * tanh(mean)) is
    # not emitted as a separate kernel; the stochastic path is the one used in
    # SAC training.
    print("KERNEL_OK")
</pallas_src>

<mosaic_0001>
module attributes {stable_mosaic.version = 11 : i64} {
  func.func @actor_kernel(%arg0: i32, %arg1: memref<8x20xf32, #tpu.memory_space<vmem>>, %arg2: memref<16x256xbf16, #tpu.memory_space<vmem>>, %arg3: memref<1x256xf32, #tpu.memory_space<vmem>>, %arg4: memref<256x256xbf16, #tpu.memory_space<vmem>>, %arg5: memref<1x256xf32, #tpu.memory_space<vmem>>, %arg6: memref<256x8xbf16, #tpu.memory_space<vmem>>, %arg7: memref<1x8xf32, #tpu.memory_space<vmem>>, %arg8: memref<8x5xf32, #tpu.memory_space<vmem>>) attributes {dimension_semantics = [#tpu.dimension_semantics<parallel>], iteration_bounds = array<i64: 1>, scalar_prefetch = 0 : i64, scratch_operands = 0 : i64, tpu.core_type = #tpu.core_type<tc>, window_params = [{transform_indices = @transform_0, window_bounds = array<i64: 8, 20>}, {pipeline_mode = #tpu.pipeline_mode<synchronous>, transform_indices = @transform_1, window_bounds = array<i64: 16, 256>}, {pipeline_mode = #tpu.pipeline_mode<synchronous>, transform_indices = @transform_2, window_bounds = array<i64: 1, 256>}, {pipeline_mode = #tpu.pipeline_mode<synchronous>, transform_indices = @transform_3, window_bounds = array<i64: 256, 256>}, {pipeline_mode = #tpu.pipeline_mode<synchronous>, transform_indices = @transform_4, window_bounds = array<i64: 1, 256>}, {pipeline_mode = #tpu.pipeline_mode<synchronous>, transform_indices = @transform_5, window_bounds = array<i64: 256, 8>}, {pipeline_mode = #tpu.pipeline_mode<synchronous>, transform_indices = @transform_6, window_bounds = array<i64: 1, 8>}, {transform_indices = @transform_7, window_bounds = array<i64: 8, 5>}]} {
    %c0 = arith.constant 0 : index
    %c0_0 = arith.constant 0 : index
    %0 = vector.load %arg1[%c0, %c0_0] : memref<8x20xf32, #tpu.memory_space<vmem>>, vector<8x20xf32>
    %1 = vector.extract_strided_slice %0 {offsets = [0, 0], sizes = [8, 16], strides = [1, 1]} : vector<8x20xf32> to vector<8x16xf32>
    %2 = vector.extract_strided_slice %0 {offsets = [0, 16], sizes = [8, 4], strides = [1, 1]} : vector<8x20xf32> to vector<8x4xf32>
    %3 = arith.truncf %1 : vector<8x16xf32> to vector<8x16xbf16>
    %c0_1 = arith.constant 0 : index
    %c0_2 = arith.constant 0 : index
    %4 = vector.load %arg2[%c0_1, %c0_2] : memref<16x256xbf16, #tpu.memory_space<vmem>>, vector<16x256xbf16>
    %cst = arith.constant dense<0.000000e+00> : vector<8x256xf32>
    %5 = tpu.matmul %3, %4, %cst {dimension_numbers = #tpu.dot_dimension_numbers<[1], [0], [0], [1], [0, 0, 1, 1], [], []>} : vector<8x16xbf16>, vector<16x256xbf16>, vector<8x256xf32> -> vector<8x256xf32>
    %c0_3 = arith.constant 0 : index
    %c0_4 = arith.constant 0 : index
    %6 = vector.load %arg3[%c0_3, %c0_4] : memref<1x256xf32, #tpu.memory_space<vmem>>, vector<1x256xf32>
    %7 = vector.broadcast %6 : vector<1x256xf32> to vector<8x256xf32>
    %8 = arith.addf %5, %7 : vector<8x256xf32>
    %cst_5 = arith.constant 0.000000e+00 : f32
    %9 = vector.broadcast %cst_5 : f32 to vector<8x256xf32>
    %10 = arith.maximumf %8, %9 : vector<8x256xf32>
    %11 = arith.truncf %10 : vector<8x256xf32> to vector<8x256xbf16>
    %c0_6 = arith.constant 0 : index
    %c0_7 = arith.constant 0 : index
    %12 = vector.load %arg4[%c0_6, %c0_7] : memref<256x256xbf16, #tpu.memory_space<vmem>>, vector<256x256xbf16>
    %cst_8 = arith.constant dense<0.000000e+00> : vector<8x256xf32>
    %13 = tpu.matmul %11, %12, %cst_8 {dimension_numbers = #tpu.dot_dimension_numbers<[1], [0], [0], [1], [0, 0, 1, 1], [], []>} : vector<8x256xbf16>, vector<256x256xbf16>, vector<8x256xf32> -> vector<8x256xf32>
    %c0_9 = arith.constant 0 : index
    %c0_10 = arith.constant 0 : index
    %14 = vector.load %arg5[%c0_9, %c0_10] : memref<1x256xf32, #tpu.memory_space<vmem>>, vector<1x256xf32>
    %15 = vector.broadcast %14 : vector<1x256xf32> to vector<8x256xf32>
    %16 = arith.addf %13, %15 : vector<8x256xf32>
    %cst_11 = arith.constant 0.000000e+00 : f32
    %17 = vector.broadcast %cst_11 : f32 to vector<8x256xf32>
    %18 = arith.maximumf %16, %17 : vector<8x256xf32>
    %19 = arith.truncf %18 : vector<8x256xf32> to vector<8x256xbf16>
    %c0_12 = arith.constant 0 : index
    %c0_13 = arith.constant 0 : index
    %20 = vector.load %arg6[%c0_12, %c0_13] : memref<256x8xbf16, #tpu.memory_space<vmem>>, vector<256x8xbf16>
    %cst_14 = arith.constant dense<0.000000e+00> : vector<8x8xf32>
    %21 = tpu.matmul %19, %20, %cst_14 {dimension_numbers = #tpu.dot_dimension_numbers<[1], [0], [0], [1], [0, 0, 1, 1], [], []>} : vector<8x256xbf16>, vector<256x8xbf16>, vector<8x8xf32> -> vector<8x8xf32>
    %c0_15 = arith.constant 0 : index
    %c0_16 = arith.constant 0 : index
    %22 = vector.load %arg7[%c0_15, %c0_16] : memref<1x8xf32, #tpu.memory_space<vmem>>, vector<1x8xf32>
    %23 = vector.broadcast %22 : vector<1x8xf32> to vector<8x8xf32>
    %24 = arith.addf %21, %23 : vector<8x8xf32>
    %25 = vector.extract_strided_slice %24 {offsets = [0, 0], sizes = [8, 4], strides = [1, 1]} : vector<8x8xf32> to vector<8x4xf32>
    %26 = vector.extract_strided_slice %24 {offsets = [0, 4], sizes = [8, 4], strides = [1, 1]} : vector<8x8xf32> to vector<8x4xf32>
    %cst_17 = arith.constant -2.000000e+01 : f32
    %cst_18 = arith.constant 2.000000e+00 : f32
    %27 = vector.broadcast %cst_17 : f32 to vector<8x4xf32>
    %28 = arith.maximumf %27, %26 : vector<8x4xf32>
    %29 = vector.broadcast %cst_18 : f32 to vector<8x4xf32>
    %30 = arith.minimumf %29, %28 : vector<8x4xf32>
    %31 = math.exp %30 : vector<8x4xf32>
    %32 = arith.mulf %31, %2 : vector<8x4xf32>
    %33 = arith.addf %25, %32 : vector<8x4xf32>
    %34 = math.tanh %33 : vector<8x4xf32>
    %cst_19 = arith.constant -5.000000e-01 : f32
    %35 = vector.broadcast %cst_19 : f32 to vector<8x4xf32>
    %36 = arith.mulf %35, %2 : vector<8x4xf32>
    %37 = arith.mulf %36, %2 : vector<8x4xf32>
    %38 = arith.subf %37, %30 : vector<8x4xf32>
    %cst_20 = arith.constant 0.918938517 : f32
    %39 = vector.broadcast %cst_20 : f32 to vector<8x4xf32>
    %40 = arith.subf %38, %39 : vector<8x4xf32>
    %41 = arith.mulf %34, %34 : vector<8x4xf32>
    %cst_21 = arith.constant 1.000000e+00 : f32
    %42 = vector.broadcast %cst_21 : f32 to vector<8x4xf32>
    %43 = arith.subf %42, %41 : vector<8x4xf32>
    %cst_22 = arith.constant 9.99999997E-7 : f32
    %44 = vector.broadcast %cst_22 : f32 to vector<8x4xf32>
    %45 = arith.addf %43, %44 : vector<8x4xf32>
    %46 = math.log %45 : vector<8x4xf32>
    %47 = arith.subf %40, %46 : vector<8x4xf32>
    %cst_23 = arith.constant dense<0.000000e+00> : vector<8xf32>
    %48 = vector.multi_reduction <add>, %47, %cst_23 [1] : vector<8x4xf32> to vector<8xf32>
    %49 = vector.shape_cast %48 : vector<8xf32> to vector<8x1xf32>
    %cst_24 = arith.constant 2.000000e+00 : f32
    %50 = vector.broadcast %cst_24 : f32 to vector<8x4xf32>
    %51 = arith.mulf %50, %34 : vector<8x4xf32>
    %52 = tpu.concatenate %51, %49 in 1 : vector<8x4xf32>, vector<8x1xf32> -> vector<8x5xf32>
    %c0_25 = arith.constant 0 : index
    %c0_26 = arith.constant 0 : index
    %53 = vector.load %arg8[%c0_25, %c0_26] : memref<8x5xf32, #tpu.memory_space<vmem>>, vector<8x5xf32>
    tpu.vector_store %arg8[%c0_25, %c0_26], %52 {strides = array<i32>} : memref<8x5xf32, #tpu.memory_space<vmem>>, vector<8x5xf32>,
    return
  }
  func.func @transform_0(%arg0: i32) -> (i32, i32) {
    %c0_i32 = arith.constant 0 : i32
    %c0_i32_0 = arith.constant 0 : i32
    return %arg0, %c0_i32 : i32, i32
  }
  func.func @transform_1(%arg0: i32) -> (i32, i32) {
    %c0_i32 = arith.constant 0 : i32
    %c0_i32_0 = arith.constant 0 : i32
    %c0_i32_1 = arith.constant 0 : i32
    return %c0_i32, %c0_i32_0 : i32, i32
  }
  func.func @transform_2(%arg0: i32) -> (i32, i32) {
    %c0_i32 = arith.constant 0 : i32
    %c0_i32_0 = arith.constant 0 : i32
    %c0_i32_1 = arith.constant 0 : i32
    return %c0_i32, %c0_i32_0 : i32, i32
  }
  func.func @transform_3(%arg0: i32) -> (i32, i32) {
    %c0_i32 = arith.constant 0 : i32
    %c0_i32_0 = arith.constant 0 : i32
    %c0_i32_1 = arith.constant 0 : i32
    return %c0_i32, %c0_i32_0 : i32, i32
  }
  func.func @transform_4(%arg0: i32) -> (i32, i32) {
    %c0_i32 = arith.constant 0 : i32
    %c0_i32_0 = arith.constant 0 : i32
    %c0_i32_1 = arith.constant 0 : i32
    return %c0_i32, %c0_i32_0 : i32, i32
  }
  func.func @transform_5(%arg0: i32) -> (i32, i32) {
    %c0_i32 = arith.constant 0 : i32
    %c0_i32_0 = arith.constant 0 : i32
    %c0_i32_1 = arith.constant 0 : i32
    return %c0_i32, %c0_i32_0 : i32, i32
  }
  func.func @transform_6(%arg0: i32) -> (i32, i32) {
    %c0_i32 = arith.constant 0 : i32
    %c0_i32_0 = arith.constant 0 : i32
    %c0_i32_1 = arith.constant 0 : i32
    return %c0_i32, %c0_i32_0 : i32, i32
  }
  func.func @transform_7(%arg0: i32) -> (i32, i32) {
    %c0_i32 = arith.constant 0 : i32
    %c0_i32_0 = arith.constant 0 : i32
    return %arg0, %c0_i32 : i32, i32
  }
}

</mosaic_0001>

<bundles_post_ra>
// kernel: tpu_custom_call.1
= control target key start
LH: loop header
LB: loop body
LE: loop exit
PB: predicated region body
PF: predicated region fallthrough
CT: control target
= control target key end

     0   :  { %12 = vsyncpa [#allocation3], 0  ;;  %s1029_s0 = inlined_call_operand.vmem [shape: f32[8,20], index: 0, kind: input, shape index: {}]   ;;  %s1030_s1 = inlined_call_operand.vmem [shape: bf16[16,256], index: 1, kind: input, shape index: {}]   ;;  %s1031_s2 = inlined_call_operand.vmem [shape: f32[1,256], index: 2, kind: input, shape index: {}]   ;;  %s1032_s3 = inlined_call_operand.hbm [shape: bf16[256,256], index: 3, kind: input, shape index: {}]   ;;  %s1033_s4 = inlined_call_operand.vmem [shape: f32[1,256], index: 4, kind: input, shape index: {}]   ;;  %s1034_s5 = inlined_call_operand.vmem [shape: bf16[256,8], index: 5, kind: input, shape index: {}]   ;;  %s1035_s6 = inlined_call_operand.vmem [shape: f32[1,8], index: 6, kind: input, shape index: {}]   ;;  %s1036_s7 = inlined_call_operand.hbm [shape: f32[8,5], index: 7, kind: output, shape index: {}]  }
   0x1   :  { %13 = vsyncpa [#allocation4], 0  ;;  %s24_s26 = sshll.u32 %s1032_s3, 4  ;;  %s893_s27 = smov [#allocation2]   ;;  %s25_s26 = int_to_ptr.hbm [resolvable:$true] %s24_s26 }
   0x2   :  { %s26_s28 = sshll.u32 %s893_s27, 4  ;;  %s894_s29 = smov 128   ;;  %s27_s28 = int_to_ptr.vmem [resolvable:$true] %s26_s28 }
   0x3   :  { %s895_s30 = smov 8  }
   0x4   :  { %32 = dma.hbm_to_vmem [thread:$0]  %s25_s26, 4096, %s27_s28, [#allocation3], %s894_s29, %s894_s29, %s895_s30  }
   0x5   :  { %889 = dma.done.wait [#allocation3], 4096  }
   0x6   :  { %890 = vsyncadd [#allocation3], 4294963200  ;;  %v574_v0 = vld [vmem:[%s1030_s1] sm:$0xf]  ;;  %v776_v1 = vld [vmem:[%s1030_s1 + $0x4] sm:$0xf0] }
   0x7   :  { %v775_v2 = vld [vmem:[%s1030_s1 + $0x4] sm:$0xf]  ;;  %v575_v3 = vor.u32 %v776_v1, %v574_v0  ;;  %v576_v4 = vld [vmem:[%s1030_s1 + $0x8] sm:$0xf0]  ;;  %vm64_vm0 = vcmask 130048   ;;  %s897_s25 = smov 12  }
   0x8   :  { %v960_v5 = vld [vmem:[%s1029_s0] sm:$0xff]  ;;  %v640_v6 = vld [vmem:[#allocation2 + $0x70] sm:$0xf]  ;;  %v579_v7 = vor.u32 %v775_v2, %v576_v4  ;;  %v792_v9 = vld [vmem:[#allocation2 + $0x74] sm:$0xf0]  ;;  %s898_s26 = smov 124  }
   0x9   :  { %v45_v8 = vpack.c.bf16 %v960_v5, %v960_v5  ;;  %v704_v10 = vld [vmem:[#allocation2 + $0xf0] sm:$0xf]  ;;  %v808_v11 = vld [vmem:[#allocation2 + $0xf4] sm:$0xf0]  ;;  %75 = vmatpush.bf16.msra.mxu0 %v575_v3  ;;  %v641_v12 = vor.u32 %v792_v9, %v640_v6  ;;  %v791_v14 = vld [vmem:[#allocation2 + $0x74] sm:$0xf] }
   0xa   :  { %v705_v13 = vor.u32 %v808_v11, %v704_v10  ;;  %v642_v15 = vld [vmem:[#allocation2 + $0x78] sm:$0xf0]  ;;  %v807_v16 = vld [vmem:[#allocation2 + $0xf4] sm:$0xf]  ;;  %88 = vmatpush.bf16.msra.mxu1 %v579_v7  ;;  %v632_v19 = vld [vmem:[#allocation2 + $0x60] sm:$0xf] }
   0xb   :  { %v645_v17 = vor.u32 %v791_v14, %v642_v15  ;;  %v706_v18 = vld [vmem:[#allocation2 + $0xf8] sm:$0xf0]  ;;  %v790_v20 = vld [vmem:[#allocation2 + $0x64] sm:$0xf0]  ;;  %296 = vmatpush.bf16.msra.mxu2 %v641_v12  ;;  %v696_v23 = vld [vmem:[#allocation2 + $0xe0] sm:$0xf] }
   0xc   :  { %309 = vmatpush.bf16.msra.mxu3 %v705_v13  ;;  %v709_v21 = vor.u32 %v807_v16, %v706_v18  ;;  %v633_v22 = vor.u32 %v790_v20, %v632_v19  ;;  %v806_v24 = vld [vmem:[#allocation2 + $0xe4] sm:$0xf0]  ;;  %v789_v25 = vld [vmem:[#allocation2 + $0x64] sm:$0xf]  ;;  %580 = vmatmul.msk.bf16.vlgmr.msra.gmra.mxu0 %vm64_vm0, %v45_v8  ;;  %v634_v27 = vld [vmem:[#allocation2 + $0x68] sm:$0xf0] }
   0xd   :  { %v697_v26 = vor.u32 %v806_v24, %v696_v23  ;;  %v805_v28 = vld [vmem:[#allocation2 + $0xe4] sm:$0xf]  ;;  %v698_v29 = vld [vmem:[#allocation2 + $0xe8] sm:$0xf0]  ;;  %581 = vmatmul.msk.bf16.vlgmr.msra.gmra.mxu1 %vm64_vm0, %v45_v8  ;;  %322 = vmatpush.bf16.msrb.mxu0 %v645_v17  ;;  %v637_v30 = vor.u32 %v789_v25, %v634_v27  ;;  %v624_v31 = vld [vmem:[#allocation2 + $0x50] sm:$0xf] }
   0xe   :  { %v788_v32 = vld [vmem:[#allocation2 + $0x54] sm:$0xf0]  ;;  %v688_v33 = vld [vmem:[#allocation2 + $0xd0] sm:$0xf]  ;;  %335 = vmatpush.bf16.msrb.mxu1 %v709_v21  ;;  %v701_v34 = vor.u32 %v805_v28, %v698_v29  ;;  %v787_v36 = vld [vmem:[#allocation2 + $0x54] sm:$0xf] }
   0xf   :  { %v804_v35 = vld [vmem:[#allocation2 + $0xd4] sm:$0xf0]  ;;  %v626_v37 = vld [vmem:[#allocation2 + $0x58] sm:$0xf0]  ;;  %297 = vmatpush.bf16.msra.mxu2 %v633_v22  ;;  %v625_v38 = vor.u32 %v788_v32, %v624_v31  ;;  %v803_v40 = vld [vmem:[#allocation2 + $0xd4] sm:$0xf] }
  0x10   :  { %310 = vmatpush.bf16.msra.mxu3 %v697_v26  ;;  %v689_v39 = vor.u32 %v804_v35, %v688_v33  ;;  %v690_v41 = vld [vmem:[#allocation2 + $0xd8] sm:$0xf0]  ;;  %v616_v42 = vld [vmem:[#allocation2 + $0x40] sm:$0xf]  ;;  %v786_v43 = vld [vmem:[#allocation2 + $0x44] sm:$0xf0]  ;;  %v629_v46 = vor.u32 %v787_v36, %v626_v37 }
  0x11   :  { %v680_v44 = vld [vmem:[#allocation2 + $0xc0] sm:$0xf]  ;;  %v802_v45 = vld [vmem:[#allocation2 + $0xc4] sm:$0xf0]  ;;  %323 = vmatpush.bf16.msrb.mxu0 %v637_v30  ;;  %v693_v47 = vor.u32 %v803_v40, %v690_v41  ;;  %v785_v48 = vld [vmem:[#allocation2 + $0x44] sm:$0xf]  ;;  %v617_v50 = vor.u32 %v786_v43, %v616_v42 }
  0x12   :  { %336 = vmatpush.bf16.msrb.mxu1 %v701_v34  ;;  %v618_v49 = vld [vmem:[#allocation2 + $0x48] sm:$0xf0]  ;;  %v681_v51 = vor.u32 %v802_v45, %v680_v44  ;;  %v801_v52 = vld [vmem:[#allocation2 + $0xc4] sm:$0xf]  ;;  %v608_v54 = vld [vmem:[#allocation2 + $0x30] sm:$0xf] }
  0x13   :  { %298 = vmatpush.bf16.msra.mxu2 %v625_v38  ;;  %v682_v53 = vld [vmem:[#allocation2 + $0xc8] sm:$0xf0]  ;;  %v784_v55 = vld [vmem:[#allocation2 + $0x34] sm:$0xf0]  ;;  %v672_v56 = vld [vmem:[#allocation2 + $0xb0] sm:$0xf]  ;;  %v621_v58 = vor.u32 %v785_v48, %v618_v49 }
  0x14   :  { %311 = vmatpush.bf16.msra.mxu3 %v689_v39  ;;  %v800_v57 = vld [vmem:[#allocation2 + $0xb4] sm:$0xf0]  ;;  %v685_v59 = vor.u32 %v801_v52, %v682_v53  ;;  %v783_v60 = vld [vmem:[#allocation2 + $0x34] sm:$0xf]  ;;  %v610_v61 = vld [vmem:[#allocation2 + $0x38] sm:$0xf0]  ;;  %v609_v63 = vor.u32 %v784_v55, %v608_v54 }
  0x15   :  { %324 = vmatpush.bf16.msrb.mxu0 %v629_v46  ;;  %v799_v62 = vld [vmem:[#allocation2 + $0xb4] sm:$0xf]  ;;  %v673_v0 = vor.u32 %v800_v57, %v672_v56  ;;  %v674_v1 = vld [vmem:[#allocation2 + $0xb8] sm:$0xf0]  ;;  %v600_v2 = vld [vmem:[#allocation2 + $0x20] sm:$0xf]  ;;  %v613_v7 = vor.u32 %v783_v60, %v610_v61 }
  0x16   :  { %337 = vmatpush.bf16.msrb.mxu1 %v693_v47  ;;  %v782_v3 = vld [vmem:[#allocation2 + $0x24] sm:$0xf0]  ;;  %v664_v4 = vld [vmem:[#allocation2 + $0xa0] sm:$0xf]  ;;  %v677_v8 = vor.u32 %v799_v62, %v674_v1  ;;  %v781_v9 = vld [vmem:[#allocation2 + $0x24] sm:$0xf] }
  0x17   :  { %299 = vmatpush.bf16.msra.mxu2 %v617_v50  ;;  %v798_v6 = vld [vmem:[#allocation2 + $0xa4] sm:$0xf0]  ;;  %v602_v10 = vld [vmem:[#allocation2 + $0x28] sm:$0xf0]  ;;  %v601_v11 = vor.u32 %v782_v3, %v600_v2  ;;  %v797_v13 = vld [vmem:[#allocation2 + $0xa4] sm:$0xf] }
  0x18   :  { %312 = vmatpush.bf16.msra.mxu3 %v681_v51  ;;  %v665_v12 = vor.u32 %v798_v6, %v664_v4  ;;  %v666_v14 = vld [vmem:[#allocation2 + $0xa8] sm:$0xf0]  ;;  %v605_v15 = vor.u32 %v781_v9, %v602_v10  ;;  %v592_v17 = vld [vmem:[#allocation2 + $0x10] sm:$0xf]  ;;  %v780_v18 = vld [vmem:[#allocation2 + $0x14] sm:$0xf0] }
  0x19   :  { %325 = vmatpush.bf16.msrb.mxu0 %v621_v58  ;;  %v669_v16 = vor.u32 %v797_v13, %v666_v14  ;;  %v656_v19 = vld [vmem:[#allocation2 + $0x90] sm:$0xf]  ;;  %v593_v20 = vor.u32 %v780_v18, %v592_v17  ;;  %v796_v21 = vld [vmem:[#allocation2 + $0x94] sm:$0xf0]  ;;  %v779_v22 = vld [vmem:[#allocation2 + $0x14] sm:$0xf] }
  0x1a   :  { %338 = vmatpush.bf16.msrb.mxu1 %v685_v59  ;;  %v594_v23 = vld [vmem:[#allocation2 + $0x18] sm:$0xf0]  ;;  %v657_v24 = vor.u32 %v796_v21, %v656_v19  ;;  %v795_v26 = vld [vmem:[#allocation2 + $0x94] sm:$0xf]  ;;  %v584_v29 = vld [vmem:[#allocation2] sm:$0xf] }
  0x1b   :  { %300 = vmatpush.bf16.msra.mxu2 %v609_v63  ;;  %v597_v25 = vor.u32 %v779_v22, %v594_v23  ;;  %v658_v27 = vld [vmem:[#allocation2 + $0x98] sm:$0xf0]  ;;  %v778_v30 = vld [vmem:[#allocation2 + $0x4] sm:$0xf0]  ;;  %v648_v31 = vld [vmem:[#allocation2 + $0x80] sm:$0xf] }
  0x1c   :  { %313 = vmatpush.bf16.msra.mxu3 %v673_v0  ;;  %v661_v28 = vor.u32 %v795_v26, %v658_v27  ;;  %v585_v32 = vor.u32 %v778_v30, %v584_v29  ;;  %v794_v33 = vld [vmem:[#allocation2 + $0x84] sm:$0xf0]  ;;  %v777_v34 = vld [vmem:[#allocation2 + $0x4] sm:$0xf]  ;;  %v586_v35 = vld [vmem:[#allocation2 + $0x8] sm:$0xf0] }
  0x1d   :  { %326 = vmatpush.bf16.msrb.mxu0 %v613_v7  ;;  %v649_v36 = vor.u32 %v794_v33, %v648_v31  ;;  %v589_v37 = vor.u32 %v777_v34, %v586_v35  ;;  %v793_v38 = vld [vmem:[#allocation2 + $0x84] sm:$0xf]  ;;  %v650_v39 = vld [vmem:[#allocation2 + $0x88] sm:$0xf0]  ;;  %v824_v41 = vld [vmem:[%s1034_s5 + $0x78] sm:$0xff]  ;;  %s900_s27 = smov 112  }
  0x1e   :  { %339 = vmatpush.bf16.msrb.mxu1 %v677_v8  ;;  %v653_v40 = vor.u32 %v793_v38, %v650_v39  ;;  %v816_v42 = vld [vmem:[%s1034_s5 + $0x38] sm:$0xff]  ;;  %v823_v43 = vld [vmem:[%s1034_s5 + $0x70] sm:$0xff]  ;;  %v822_v45 = vld [vmem:[%s1034_s5 + $0x68] sm:$0xff]  ;;  %vm547_vm1 = vcmask 31744   ;;  %s901_s28 = smov [#allocation5]   ;;  %s562_s9 = sshll.u32 %s1036_s7, 4  ;;  %s563_s9 = int_to_ptr.hbm [resolvable:$true] %s562_s9 }
  0x1f   :  { %301 = vmatpush.bf16.msra.mxu2 %v601_v11  ;;  %v815_v44 = vld [vmem:[%s1034_s5 + $0x30] sm:$0xff]  ;;  %v814_v46 = vld [vmem:[%s1034_s5 + $0x28] sm:$0xff]  ;;  %v821_v47 = vld [vmem:[%s1034_s5 + $0x60] sm:$0xff]  ;;  %s560_s29 = sshll.u32 %s901_s28, 4  ;;  %vm553_vm2 = vcmask 39936   ;;  %s561_s29 = int_to_ptr.vmem [resolvable:$true] %s560_s29 }
  0x20   :  { %314 = vmatpush.bf16.msra.mxu3 %v665_v12  ;;  %v813_v48 = vld [vmem:[%s1034_s5 + $0x20] sm:$0xff]  ;;  %v820_v49 = vld [vmem:[%s1034_s5 + $0x58] sm:$0xff]  ;;  %v819_v51 = vld [vmem:[%s1034_s5 + $0x50] sm:$0xff] }
  0x21   :  { %327 = vmatpush.bf16.msrb.mxu0 %v605_v15  ;;  %v48_v50 = vld [vmem:[%s1031_s2] sm:$0x3]  ;;  %s896_s2 = smov 116   ;;  %v812_v0 = vld [vmem:[%s1034_s5 + $0x18] sm:$0xff]  ;;  %v818_v1 = vld [vmem:[%s1034_s5 + $0x48] sm:$0xff] }
  0x22   :  { %340 = vmatpush.bf16.msrb.mxu1 %v669_v16  ;;  %v50_v52 = vperm.slane %v48_v50, 0  ;;  %v51_v53 = vperm.slane %v48_v50, 1  ;;  %515 = vrot.lane.b32.xlu0 %v960_v5, %s896_s2  ;;  %v811_v2 = vld [vmem:[%s1034_s5 + $0x10] sm:$0xff]  ;;  %v817_v3 = vld [vmem:[%s1034_s5 + $0x40] sm:$0xff]  ;;  %v810_v4 = vld [vmem:[%s1034_s5 + $0x8] sm:$0xff] }
  0x23   :  { %302 = vmatpush.bf16.msra.mxu2 %v593_v20  ;;  %v809_v6 = vld [vmem:[%s1034_s5] sm:$0xff] }
  0x24   :  { %315 = vmatpush.bf16.msra.mxu3 %v657_v24  ;;  %v130_v7 = vld [vmem:[%s1033_s4] sm:$0x3] }
  0x25   :  { %328 = vmatpush.bf16.msrb.mxu0 %v597_v25  ;;  %v133_v8 = vperm.slane %v130_v7, 1  ;;  %v132_v13 = vperm.slane %v130_v7, 0  ;;  %v834_v27 = vld [vmem:[%s1035_s6] ss:$0 sm:$0xff]  ;;  %s899_s6 = smov 16  }
  0x26   :  { %341 = vmatpush.bf16.msrb.mxu1 %v661_v28 }
  0x27   :  { %303 = vmatpush.bf16.msra.mxu2 %v585_v32 }
  0x28   :  { %316 = vmatpush.bf16.msra.mxu3 %v649_v36 }
  0x29   :  { %329 = vmatpush.bf16.msrb.mxu0 %v589_v37 }
  0x2a   :  { %342 = vmatpush.bf16.msrb.mxu1 %v653_v40 }
  0x2b   :  { %484 = vmatpush.bf16.msrb.mxu2 %v816_v42 }
  0x2c   :  { %497 = vmatpush.bf16.msrb.mxu3 %v824_v41 }
  0x2f   :  { %485 = vmatpush.bf16.msrb.mxu2 %v815_v44 }
  0x30   :  { %498 = vmatpush.bf16.msrb.mxu3 %v823_v43 }
  0x33   :  { %486 = vmatpush.bf16.msrb.mxu2 %v814_v46 }
  0x34   :  { %499 = vmatpush.bf16.msrb.mxu3 %v822_v45 }
  0x37   :  { %487 = vmatpush.bf16.msrb.mxu2 %v813_v48 }
  0x38   :  { %500 = vmatpush.bf16.msrb.mxu3 %v821_v47  ;;  %v525_v47 = vmul.f32 -0.5, %v960_v5 }
  0x3a   :  { %v526_v48 = vmul.f32 %v525_v47, %v960_v5 }
  0x3b   :  { %488 = vmatpush.bf16.msrb.mxu2 %v812_v0 }
  0x3c   :  { %501 = vmatpush.bf16.msrb.mxu3 %v820_v49 }
  0x3f   :  { %489 = vmatpush.bf16.msrb.mxu2 %v811_v2 }
  0x40   :  { %502 = vmatpush.bf16.msrb.mxu3 %v819_v51 }
  0x43   :  { %490 = vmatpush.bf16.msrb.mxu2 %v810_v4 }
  0x44   :  { %503 = vmatpush.bf16.msrb.mxu3 %v818_v1 }
  0x47   :  { %491 = vmatpush.bf16.msrb.mxu2 %v809_v6 }
  0x48   :  { %504 = vmatpush.bf16.msrb.mxu3 %v817_v3 }
  0x89   :  { %v77_v54 = vpop.f32.mrf.mxu0 }
  0x8a   :  { %v78_v55 = vadd.f32 %v77_v54, %v50_v52  ;;  %v90_v56 = vpop.f32.mrf.mxu1 }
  0x8b   :  { %v91_v57 = vadd.f32 %v90_v56, %v51_v53 }
  0x8c   :  { %v94_v58 = vmax.f32 %v78_v55, 0.0 }
  0x8d   :  { %v95_v59 = vmax.f32 %v91_v57, 0.0 }
  0x8e   :  { %v96_v60 = vpack.c.bf16 %v94_v58, %v94_v58 }
  0x8f   :  { %v97_v61 = vpack.c.bf16 %v95_v59, %v95_v59 }
  0x90   :  { %304 = vmatmul.bf16.vlgmr.msra.gmra.mxu2 %v96_v60  ;;  %330 = vmatmul.bf16.vlgmr.msrb.gmra.mxu0 %v96_v60 }
  0x91   :  { %317 = vmatmul.bf16.vlgmr.msra.gmra.mxu3 %v97_v61  ;;  %343 = vmatmul.bf16.vlgmr.msrb.gmra.mxu1 %v97_v61  ;;  %v79_v62 = vpop.f32.mrf.mxu0 }
  0x92   :  { %v92_v63 = vpop.f32.mrf.mxu1 }
  0x94   :  { %v516_v36 = vpop.permute.xlu0 %515 }
 0x10d   :  { %v331_v9 = vpop.f32.mrf.mxu0 }
 0x10e   :  { %v332_v10 = vadd.f32 %v331_v9, %v133_v8  ;;  %v344_v11 = vpop.f32.mrf.mxu1 }
 0x110   :  { %v345_v12 = vadd.f32 %v344_v11, %v332_v10 }
 0x112   :  { %v349_v14 = vmax.f32 %v345_v12, 0.0 }
 0x113   :  { %v305_v15 = vpop.f32.mrf.mxu2 }
 0x114   :  { %v351_v16 = vpack.c.bf16 %v349_v14, %v349_v14  ;;  %v306_v17 = vadd.f32 %v305_v15, %v132_v13  ;;  %v318_v18 = vpop.f32.mrf.mxu3 }
 0x115   :  { %v333_v19 = vpop.f32.mrf.mxu0 }
 0x116   :  { %v319_v20 = vadd.f32 %v318_v18, %v306_v17  ;;  %v346_v21 = vpop.f32.mrf.mxu1  ;;  %505 = vmatmul.bf16.vlgmr.msrb.gmra.mxu3 %v351_v16 }
 0x118   :  { %v348_v22 = vmax.f32 %v319_v20, 0.0 }
 0x11a   :  { %v350_v23 = vpack.c.bf16 %v348_v22, %v348_v22 }
 0x11b   :  { %v307_v24 = vpop.f32.mrf.mxu2 }
 0x11c   :  { %v320_v25 = vpop.f32.mrf.mxu3  ;;  %492 = vmatmul.bf16.vlgmr.msrb.gmra.mxu2 %v350_v23 }
 0x199   :  { %v506_v26 = vpop.f32.mrf.mxu3 }
 0x19f   :  { %v493_v28 = vpop.f32.mrf.mxu2 }
 0x1a0   :  { %v494_v29 = vadd.f32 %v834_v27, %v493_v28 }
 0x1a1   :  { %v508_v30 = vpop.f32.mrf.mxu3 }
 0x1a2   :  { %v507_v31 = vadd.f32 %v506_v26, %v494_v29 }
 0x1a4   :  { %v510_v32 = vmax.f32 %v507_v31, -20.0 }
 0x1a6   :  { %v511_v33 = vmin.f32 %v510_v32, 2.0 }
 0x1a7   :  { %v495_v34 = vpop.f32.mrf.mxu2 }
 0x1a8   :  { %528 = vrot.lane.b32.xlu1 %v511_v33, %s897_s25  ;;  %v512_v35 = vmul.f32 1.442695, %v511_v33 }
 0x1aa   :  { %835 = vpow2.f32 %v512_v35 }
 0x1b0   :  { %v836_v37 = vpop.eup %835 }
 0x1b1   :  { %v518_v38 = vmul.f32 %v836_v37, %v516_v36 }
 0x1b3   :  { %520 = vrot.lane.b32.xlu0 %v518_v38, %s898_s26 }
 0x21a   :  { %v529_v49 = vpop.permute.xlu1 %528 }
 0x21b   :  { %v531_v50 = vsub.f32 %v526_v48, %v529_v49 }
 0x21d   :  { %v774_v51 = vadd.f32 -0.9189385, %v531_v50 }
 0x225   :  { %v521_v39 = vpop.permute.xlu0 %520 }
 0x226   :  { %v523_v40 = vadd.f32 %v521_v39, %v507_v31 }
 0x228   :  { %837 = vtanh.f32 %v523_v40 }
 0x22e   :  { %v838_v41 = vpop.eup %837 }
 0x22f   :  { %v533_v42 = vmul.f32 %v838_v41, %v838_v41  ;;  %v551_v56 = vmul.f32 2.0, %v838_v41 }
 0x231   :  { %v534_v43 = vsub.f32 1.0, %v533_v42 }
 0x233   :  { %v535_v44 = vadd.f32 1e-06, %v534_v43 }
 0x235   :  { %839 = vlog2.f32 %v535_v44 }
 0x23b   :  { %v840_v45 = vpop.eup %839 }
 0x23c   :  { %v537_v46 = vmul.f32 0.6931472, %v840_v45 }
 0x23e   :  { %539 = vrot.lane.b32.xlu1 %v537_v46, %s899_s6 }
 0x2b0   :  { %v540_v52 = vpop.permute.xlu1 %539 }
 0x2b1   :  { %v542_v53 = vsub.f32 %v774_v51, %v540_v52 }
 0x2b3   :  { %544 = vrot.lane.b32.xlu2 %v542_v53, %s900_s27 }
 0x30d   :  { %v545_v54 = vpop.permute.xlu2 %544 }
 0x30e   :  { %v548_v55 = vsel %vm547_vm1, %v545_v54, 0.0 }
 0x30f   :  { %549 = vadd.xlane.f32.xlu2 %v548_v55 }
 0x382   :  { %v550_v5 = vpop.xlane.xlu2 %549 }
 0x383   :  { %v552_v57 = vsel %vm547_vm1, %v551_v56, %v550_v5 }
 0x384   :  { %554 = vst.msk [vmem:[#allocation5] sm:$0xff] %vm553_vm2, %v552_v57 }
 0x385   :  { %565 = dma.vmem_to_hbm [thread:$0]  %s561_s29, 128, %s563_s9, [#allocation4]  }
 0x386   :  { %891 = dma.done.wait [#allocation4], 128  }
 0x387   :  { %892 = vsyncadd [#allocation4], 4294967168 }
 0x388   :  { %570 = vsyncpa [#allocation3], 1 }
 0x389   :  { %571 = vsyncpa [#allocation4], 1 }

</bundles_post_ra>
